<compile_context>
chip_gen: v7x
topology: tpu7x:2x2x1
jax: 0.10.0
libtpu: 0.0.40
codegen_flags: <defaults>
</compile_context>

<pallas_src>
import functools

import jax
import jax.numpy as jnp
from jax.experimental import pallas as pl
from jax.experimental.pallas import tpu as pltpu

EPS = 1e-3  # BatchNorm2d eps


def _has_bf16_vpu() -> bool:
    """v6e/v7x have a bf16 VALU path; v2-v5 do not (keep f32 elementwise there)."""
    try:
        kind = jax.devices()[0].device_kind.lower()
    except Exception:
        return False
    return not any(f"v{n}" in kind for n in (2, 3, 4, 5))


def _fused_kernel(s_ref, x_ref, w_ref, gamma_ref, beta_ref, o_ref, *, bf16_vpu):
    # s_ref:     [1, C_in]     gate logits (pre-sigmoid), f32
    # x_ref:     [C_in, HW]    NCHW-native activations (free reshape of [1,C,H,W])
    # w_ref:     [C_out, C_in] 1x1 conv weight
    # gamma_ref: [C_out, 1]    f32
    # beta_ref:  [C_out, 1]    f32
    # o_ref:     [C_out, HW]
    s = jax.nn.sigmoid(s_ref[...].astype(jnp.float32))          # [1, C_in], tiny (EUP)

    # Fold the gate into the (small) weight tile instead of scaling the activations.
    w = w_ref[...]
    if bf16_vpu and w.dtype == jnp.bfloat16:
        # v6e/v7x: bf16 VPU multiply directly into the bf16 weight (no f32 round-trip).
        w_scaled = w * s.astype(jnp.bfloat16)                    # [C_out, C_in] bf16
    else:
        # v5e-safe path: f32 VPU fold, then one cast to bf16 for the MXU.
        w_scaled = (w.astype(jnp.float32) * s).astype(jnp.bfloat16)

    x = x_ref[...]
    if x.dtype != jnp.bfloat16:                                  # pass-through if already bf16
        x = x.astype(jnp.bfloat16)

    # 1x1 conv == matmul: [C_out, C_in] @ [C_in, HW] on the MXU, f32 accumulation.
    y = jnp.dot(w_scaled, x, preferred_element_type=jnp.float32)  # [C_out, HW] f32

    # Training-mode BatchNorm over (N, H, W) == lane axis here. Single-pass stats
    # (sum and sum-of-squares in f32), then affine folded into per-channel scale/shift.
    inv_n = jnp.float32(1.0 / y.shape[-1])
    mean = jnp.sum(y, axis=-1, keepdims=True) * inv_n            # [C_out, 1]
    mean_sq = jnp.sum(y * y, axis=-1, keepdims=True) * inv_n     # [C_out, 1]
    var = mean_sq - mean * mean                                  # biased variance
    a = gamma_ref[...].astype(jnp.float32) * jax.lax.rsqrt(var + EPS)   # [C_out, 1]
    b = beta_ref[...].astype(jnp.float32) - mean * a                    # [C_out, 1]
    o_ref[...] = (y * a + b).astype(o_ref.dtype)                 # 2 full-tile VPU passes


def fused_se_conv_bn(x105, x101, conv_w, gamma, beta):
    """x105: [N, C_in, 1, 1], x101: [N, C_in, H, W], conv_w: [C_out, C_in, 1, 1].

    x101 / conv_w may be bf16 (preferred: halves HBM traffic) or f32.
    Output dtype matches x101.dtype.
    """
    N, C_in, H, W = x101.shape
    C_out = conv_w.shape[0]
    # Folding the per-channel gate into the weight requires a single sample
    # (the module's shapes have N == 1).
    assert N == 1, "kernel assumes batch size 1 (gate folded into weight)"
    HW = H * W

    # All of these are free views (no HBM copies) for NCHW with N == 1.
    x_cm = x101.reshape(C_in, HW)                      # [C_in, HW]
    s_row = x105.reshape(1, C_in).astype(jnp.float32)  # [1, C_in] (tiny; sigmoid in f32)
    w_mat = conv_w.reshape(C_out, C_in)                # [C_out, C_in]
    g_col = gamma.reshape(C_out, 1).astype(jnp.float32)
    b_col = beta.reshape(C_out, 1).astype(jnp.float32)

    out_dtype = x101.dtype
    bytes_accessed = (
        x_cm.size * x_cm.dtype.itemsize
        + w_mat.size * w_mat.dtype.itemsize
        + C_out * HW * jnp.dtype(out_dtype).itemsize
    )

    kernel = functools.partial(_fused_kernel, bf16_vpu=_has_bf16_vpu())

    out_cm = pl.pallas_call(
        kernel,
        out_shape=jax.ShapeDtypeStruct((C_out, HW), out_dtype),
        in_specs=[
            pl.BlockSpec((1, C_in), lambda: (0, 0)),
            pl.BlockSpec((C_in, HW), lambda: (0, 0)),
            pl.BlockSpec((C_out, C_in), lambda: (0, 0)),
            pl.BlockSpec((C_out, 1), lambda: (0, 0)),
            pl.BlockSpec((C_out, 1), lambda: (0, 0)),
        ],
        out_specs=pl.BlockSpec((C_out, HW), lambda: (0, 0)),
        compiler_params=pltpu.CompilerParams(vmem_limit_bytes=8 << 20),
        cost_estimate=pl.CostEstimate(
            flops=2 * C_out * C_in * HW,
            transcendentals=C_in,
            bytes_accessed=bytes_accessed,
        ),
    )(s_row, x_cm, w_mat, g_col, b_col)

    # [C_out, HW] -> [1, C_out, H, W]  (free reshape, no transpose)
    return out_cm.reshape(N, C_out, H, W)


def reference(x105, x101_f32, conv_w_f32, gamma, beta):
    """Pure-f32 reference of the module forward (from already-quantized inputs)."""
    s = jax.nn.sigmoid(x105.astype(jnp.float32))
    x = s * x101_f32
    y = jnp.einsum('nchw,oc->nohw', x,
                   conv_w_f32.reshape(conv_w_f32.shape[0], conv_w_f32.shape[1]))
    mean = jnp.mean(y, axis=(0, 2, 3), keepdims=True)
    var = jnp.mean((y - mean) ** 2, axis=(0, 2, 3), keepdims=True)
    yn = (y - mean) / jnp.sqrt(var + EPS)
    return yn * gamma.reshape(1, -1, 1, 1) + beta.reshape(1, -1, 1, 1)


if __name__ == "__main__":
    key = jax.random.PRNGKey(0)
    k1, k2, k3, k4, k5 = jax.random.split(key, 5)

    N, C_in, H, W, C_out = 1, 512, 14, 14, 128

    # Big operands arrive in bf16 at the kernel interface (halves DMA bytes);
    # the reference consumes the SAME bf16-quantized values upcast to f32, so the
    # comparison isolates kernel numerics (bf16 MXU products, bf16 output store).
    x101 = jax.random.normal(k1, (N, C_in, H, W), dtype=jnp.float32).astype(jnp.bfloat16)
    x105 = jax.random.normal(k2, (N, C_in, 1, 1), dtype=jnp.float32)

    # Deterministic parameter init (synthetic; no checkpoint load).
    conv_w = (jax.random.normal(k3, (C_out, C_in, 1, 1), dtype=jnp.float32)
              * 0.02).astype(jnp.bfloat16)
    gamma = jnp.ones((C_out,), dtype=jnp.float32) + 0.1 * jax.random.normal(k4, (C_out,))
    beta = 0.1 * jax.random.normal(k5, (C_out,), dtype=jnp.float32)

    out = fused_se_conv_bn(x105, x101, conv_w, gamma, beta)
    out = jax.block_until_ready(out)

    ref = reference(x105, x101.astype(jnp.float32), conv_w.astype(jnp.float32),
                    gamma, beta)
    assert out.shape == (N, C_out, H, W), out.shape
    # Tolerance covers bf16 MXU operands (f32 accumulation, f32 BN stats) and the
    # bf16 output store; the reference matmul/BN are pure f32.
    err = float(jnp.max(jnp.abs(out.astype(jnp.float32) - ref)))
    assert jnp.allclose(out.astype(jnp.float32), ref, atol=2e-2, rtol=2e-2), err

    print("KERNEL_OK")
</pallas_src>

<mosaic_0001>
module attributes {stable_mosaic.version = 11 : i64} {
  func.func @_fused_kernel(%arg0: memref<1x512xf32, #tpu.memory_space<vmem>>, %arg1: memref<512x196xbf16, #tpu.memory_space<vmem>>, %arg2: memref<128x512xbf16, #tpu.memory_space<vmem>>, %arg3: memref<128x1xf32, #tpu.memory_space<vmem>>, %arg4: memref<128x1xf32, #tpu.memory_space<vmem>>, %arg5: memref<128x196xbf16, #tpu.memory_space<vmem>>) attributes {dimension_semantics = [], scalar_prefetch = 0 : i64, scratch_operands = 0 : i64, tpu.core_type = #tpu.core_type<tc>} {
    %c0 = arith.constant 0 : index
    %c0_0 = arith.constant 0 : index
    %0 = vector.load %arg0[%c0, %c0_0] : memref<1x512xf32, #tpu.memory_space<vmem>>, vector<1x512xf32>
    %1 = arith.negf %0 : vector<1x512xf32>
    %2 = math.exp %1 : vector<1x512xf32>
    %cst = arith.constant 1.000000e+00 : f32
    %3 = vector.broadcast %cst : f32 to vector<1x512xf32>
    %4 = arith.addf %3, %2 : vector<1x512xf32>
    %5 = arith.divf %3, %4 : vector<1x512xf32>
    %c0_1 = arith.constant 0 : index
    %c0_2 = arith.constant 0 : index
    %6 = vector.load %arg2[%c0_1, %c0_2] : memref<128x512xbf16, #tpu.memory_space<vmem>>, vector<128x512xbf16>
    %7 = arith.truncf %5 : vector<1x512xf32> to vector<1x512xbf16>
    %8 = vector.broadcast %7 : vector<1x512xbf16> to vector<128x512xbf16>
    %9 = arith.mulf %6, %8 : vector<128x512xbf16>
    %c0_3 = arith.constant 0 : index
    %c0_4 = arith.constant 0 : index
    %10 = vector.load %arg1[%c0_3, %c0_4] : memref<512x196xbf16, #tpu.memory_space<vmem>>, vector<512x196xbf16>
    %cst_5 = arith.constant dense<0.000000e+00> : vector<128x196xf32>
    %11 = tpu.matmul %9, %10, %cst_5 {dimension_numbers = #tpu.dot_dimension_numbers<[1], [0], [0], [1], [0, 0, 1, 1], [], []>} : vector<128x512xbf16>, vector<512x196xbf16>, vector<128x196xf32> -> vector<128x196xf32>
    %cst_6 = arith.constant dense<0.000000e+00> : vector<128xf32>
    %12 = vector.multi_reduction <add>, %11, %cst_6 [1] : vector<128x196xf32> to vector<128xf32>
    %13 = vector.shape_cast %12 : vector<128xf32> to vector<128x1xf32>
    %cst_7 = arith.constant 0.00510204071 : f32
    %14 = vector.broadcast %cst_7 : f32 to vector<128x1xf32>
    %15 = arith.mulf %13, %14 : vector<128x1xf32>
    %16 = arith.mulf %11, %11 : vector<128x196xf32>
    %cst_8 = arith.constant dense<0.000000e+00> : vector<128xf32>
    %17 = vector.multi_reduction <add>, %16, %cst_8 [1] : vector<128x196xf32> to vector<128xf32>
    %18 = vector.shape_cast %17 : vector<128xf32> to vector<128x1xf32>
    %cst_9 = arith.constant 0.00510204071 : f32
    %19 = vector.broadcast %cst_9 : f32 to vector<128x1xf32>
    %20 = arith.mulf %18, %19 : vector<128x1xf32>
    %21 = arith.mulf %15, %15 : vector<128x1xf32>
    %22 = arith.subf %20, %21 : vector<128x1xf32>
    %c0_10 = arith.constant 0 : index
    %c0_11 = arith.constant 0 : index
    %23 = vector.load %arg3[%c0_10, %c0_11] : memref<128x1xf32, #tpu.memory_space<vmem>>, vector<128x1xf32>
    %cst_12 = arith.constant 1.000000e-03 : f32
    %24 = vector.broadcast %cst_12 : f32 to vector<128x1xf32>
    %25 = arith.addf %22, %24 : vector<128x1xf32>
    %26 = math.rsqrt %25 : vector<128x1xf32>
    %27 = arith.mulf %23, %26 : vector<128x1xf32>
    %c0_13 = arith.constant 0 : index
    %c0_14 = arith.constant 0 : index
    %28 = vector.load %arg4[%c0_13, %c0_14] : memref<128x1xf32, #tpu.memory_space<vmem>>, vector<128x1xf32>
    %29 = arith.mulf %15, %27 : vector<128x1xf32>
    %30 = arith.subf %28, %29 : vector<128x1xf32>
    %31 = vector.broadcast %27 : vector<128x1xf32> to vector<128x196xf32>
    %32 = arith.mulf %11, %31 : vector<128x196xf32>
    %33 = vector.broadcast %30 : vector<128x1xf32> to vector<128x196xf32>
    %34 = arith.addf %32, %33 : vector<128x196xf32>
    %35 = arith.truncf %34 : vector<128x196xf32> to vector<128x196xbf16>
    %c0_15 = arith.constant 0 : index
    %c0_16 = arith.constant 0 : index
    %36 = vector.load %arg5[%c0_15, %c0_16] : memref<128x196xbf16, #tpu.memory_space<vmem>>, vector<128x196xbf16>
    tpu.vector_store %arg5[%c0_15, %c0_16], %35 {strides = array<i32>} : memref<128x196xbf16, #tpu.memory_space<vmem>>, vector<128x196xbf16>,
    return
  }
}

</mosaic_0001>

<bundles_post_ra>
// kernel: tpu_custom_call.1
= control target key start
LH: loop header
LB: loop body
LE: loop exit
PB: predicated region body
PF: predicated region fallthrough
CT: control target
= control target key end

     0   :  { %vm926_vm0 = vcmask 556032   ;;  %vm1583_vm1 = vcmask 1043456   ;;  %vm1584_vm2 = vcmask 556036   ;;  %s2736_s1 = inlined_call_operand.vmem [shape: bf16[512,196], index: 1, kind: input, shape index: {}]   ;;  %s2737_s0 = inlined_call_operand.vmem [shape: f32[1,512], index: 0, kind: input, shape index: {}]   ;;  %s2738_s2 = inlined_call_operand.vmem [shape: bf16[128,512], index: 2, kind: input, shape index: {}]   ;;  %s2739_s3 = inlined_call_operand.vmem [shape: f32[128,1], index: 3, kind: input, shape index: {}]   ;;  %s2740_s4 = inlined_call_operand.vmem [shape: f32[128,1], index: 4, kind: input, shape index: {}]   ;;  %s2741_s5 = inlined_call_operand.vmem [shape: bf16[128,196], index: 5, kind: output, shape index: {}]  }
   0x1   :  { %v1772_v0 = vld [vmem:[%s2736_s1 + $0x4] ss:$8 sps:$4 sm:$0xff]   ;;  %v1776_v2 = vld [vmem:[%s2736_s1] ss:$8 sps:$4 sm:$0xff]   ;;  %v1778_v4 = vld [vmem:[%s2736_s1 + $0x14] ss:$8 sps:$4 sm:$0xff]  }
   0x2   :  { %v1774_v1 = vld [vmem:[%s2736_s1 + $0x104] ss:$8 sps:$4 sm:$0xff]   ;;  %700 = vmatprep.subr.bf16.mxu1 %v1772_v0  ;;  %v1777_v3 = vld [vmem:[%s2736_s1 + $0x100] ss:$8 sps:$4 sm:$0xff]   ;;  %v1780_v5 = vld [vmem:[%s2736_s1 + $0x114] ss:$8 sps:$4 sm:$0xff]  }
   0x3   :  { %813 = vmatprep.subr.bf16.mxu0 %v1774_v1  ;;  %701 = vmatpush1.bf16.msra.mxu1 %v1776_v2  ;;  %v1782_v6 = vld [vmem:[%s2736_s1 + $0x10] ss:$8 sps:$4 sm:$0xff]   ;;  %v1784_v8 = vld [vmem:[%s2736_s1 + $0x24] ss:$8 sps:$4 sm:$0xff]   ;;  %v1788_v10 = vld [vmem:[%s2736_s1 + $0x20] ss:$8 sps:$4 sm:$0xff]   ;;  %v60_v2 = vlaneseq }
   0x4   :  { %814 = vmatpush1.bf16.msra.mxu0 %v1777_v3  ;;  %702 = vmatprep.subr.bf16.mxu1 %v1778_v4  ;;  %v1783_v7 = vld [vmem:[%s2736_s1 + $0x110] ss:$8 sps:$4 sm:$0xff]   ;;  %v1786_v9 = vld [vmem:[%s2736_s1 + $0x124] ss:$8 sps:$4 sm:$0xff]   ;;  %v1789_v11 = vld [vmem:[%s2736_s1 + $0x120] ss:$8 sps:$4 sm:$0xff]  }
   0x5   :  { %815 = vmatprep.subr.bf16.mxu0 %v1780_v5  ;;  %v1790_v12 = vld [vmem:[%s2736_s1 + $0x34] ss:$8 sps:$4 sm:$0xff]   ;;  %v1794_v14 = vld [vmem:[%s2736_s1 + $0x30] ss:$8 sps:$4 sm:$0xff]   ;;  %v1796_v16 = vld [vmem:[%s2736_s1 + $0x44] ss:$8 sps:$4 sm:$0xff]  }
   0x6   :  { %v1792_v13 = vld [vmem:[%s2736_s1 + $0x134] ss:$8 sps:$4 sm:$0xff]   ;;  %v1795_v15 = vld [vmem:[%s2736_s1 + $0x130] ss:$8 sps:$4 sm:$0xff]   ;;  %v1798_v17 = vld [vmem:[%s2736_s1 + $0x144] ss:$8 sps:$4 sm:$0xff]  }
   0x7   :  { %703 = vmatpush1.bf16.msra.mxu1 %v1782_v6  ;;  %v1800_v18 = vld [vmem:[%s2736_s1 + $0x40] ss:$8 sps:$4 sm:$0xff]   ;;  %v1802_v20 = vld [vmem:[%s2736_s1 + $0x54] ss:$8 sps:$4 sm:$0xff]   ;;  %v1806_v22 = vld [vmem:[%s2736_s1 + $0x50] ss:$8 sps:$4 sm:$0xff]  }
   0x8   :  { %816 = vmatpush1.bf16.msra.mxu0 %v1783_v7  ;;  %704 = vmatprep.subr.bf16.mxu1 %v1784_v8  ;;  %v1801_v19 = vld [vmem:[%s2736_s1 + $0x140] ss:$8 sps:$4 sm:$0xff]   ;;  %v1804_v21 = vld [vmem:[%s2736_s1 + $0x154] ss:$8 sps:$4 sm:$0xff]   ;;  %v1807_v23 = vld [vmem:[%s2736_s1 + $0x150] ss:$8 sps:$4 sm:$0xff]  }
   0x9   :  { %817 = vmatprep.subr.bf16.mxu0 %v1786_v9  ;;  %v1808_v24 = vld [vmem:[%s2736_s1 + $0x64] ss:$8 sps:$4 sm:$0xff]   ;;  %v1812_v26 = vld [vmem:[%s2736_s1 + $0x60] ss:$8 sps:$4 sm:$0xff]   ;;  %v1814_v28 = vld [vmem:[%s2736_s1 + $0x74] ss:$8 sps:$4 sm:$0xff]  }
   0xa   :  { %v1810_v25 = vld [vmem:[%s2736_s1 + $0x164] ss:$8 sps:$4 sm:$0xff]   ;;  %v1813_v27 = vld [vmem:[%s2736_s1 + $0x160] ss:$8 sps:$4 sm:$0xff]   ;;  %v1816_v29 = vld [vmem:[%s2736_s1 + $0x174] ss:$8 sps:$4 sm:$0xff]  }
   0xb   :  { %705 = vmatpush1.bf16.msra.mxu1 %v1788_v10  ;;  %v1818_v30 = vld [vmem:[%s2736_s1 + $0x70] ss:$8 sps:$4 sm:$0xff]   ;;  %v1820_v32 = vld [vmem:[%s2736_s1 + $0x84] ss:$8 sps:$4 sm:$0xff]   ;;  %v1824_v34 = vld [vmem:[%s2736_s1 + $0x80] ss:$8 sps:$4 sm:$0xff]  }
   0xc   :  { %818 = vmatpush1.bf16.msra.mxu0 %v1789_v11  ;;  %706 = vmatprep.subr.bf16.mxu1 %v1790_v12  ;;  %v1819_v31 = vld [vmem:[%s2736_s1 + $0x170] ss:$8 sps:$4 sm:$0xff]   ;;  %v1822_v33 = vld [vmem:[%s2736_s1 + $0x184] ss:$8 sps:$4 sm:$0xff]   ;;  %v1825_v35 = vld [vmem:[%s2736_s1 + $0x180] ss:$8 sps:$4 sm:$0xff]  }
   0xd   :  { %819 = vmatprep.subr.bf16.mxu0 %v1792_v13  ;;  %v1826_v36 = vld [vmem:[%s2736_s1 + $0x94] ss:$8 sps:$4 sm:$0xff]   ;;  %v1830_v38 = vld [vmem:[%s2736_s1 + $0x90] ss:$8 sps:$4 sm:$0xff]   ;;  %v1832_v40 = vld [vmem:[%s2736_s1 + $0xa4] ss:$8 sps:$4 sm:$0xff]  }
   0xe   :  { %v1828_v37 = vld [vmem:[%s2736_s1 + $0x194] ss:$8 sps:$4 sm:$0xff]   ;;  %v1831_v39 = vld [vmem:[%s2736_s1 + $0x190] ss:$8 sps:$4 sm:$0xff]   ;;  %v1834_v41 = vld [vmem:[%s2736_s1 + $0x1a4] ss:$8 sps:$4 sm:$0xff]  }
   0xf   :  { %707 = vmatpush1.bf16.msra.mxu1 %v1794_v14  ;;  %v1836_v42 = vld [vmem:[%s2736_s1 + $0xa0] ss:$8 sps:$4 sm:$0xff]   ;;  %v1838_v44 = vld [vmem:[%s2736_s1 + $0xb4] ss:$8 sps:$4 sm:$0xff]   ;;  %v1842_v48 = vld [vmem:[%s2736_s1 + $0xb0] ss:$8 sps:$4 sm:$0xff]  }
  0x10   :  { %820 = vmatpush1.bf16.msra.mxu0 %v1795_v15  ;;  %708 = vmatprep.subr.bf16.mxu1 %v1796_v16  ;;  %v1837_v43 = vld [vmem:[%s2736_s1 + $0x1a0] ss:$8 sps:$4 sm:$0xff]   ;;  %v1840_v45 = vld [vmem:[%s2736_s1 + $0x1b4] ss:$8 sps:$4 sm:$0xff]   ;;  %v1843_v49 = vld [vmem:[%s2736_s1 + $0x1b0] ss:$8 sps:$4 sm:$0xff]  }
  0x11   :  { %821 = vmatprep.subr.bf16.mxu0 %v1798_v17  ;;  %v20_v46 = vld [vmem:[%s2737_s0] sm:$0xf]  ;;  %v1844_v50 = vld [vmem:[%s2736_s1 + $0xc4] ss:$8 sps:$4 sm:$0xff]   ;;  %v1850_v54 = vld [vmem:[%s2736_s1 + $0xd4] ss:$8 sps:$4 sm:$0xff]  }
  0x12   :  { %v1606_v47 = vmul.f32 -1.442695, %v20_v46  ;;  %v1846_v51 = vld [vmem:[%s2736_s1 + $0x1c4] ss:$8 sps:$4 sm:$0xff]   ;;  %v1848_v52 = vld [vmem:[%s2736_s1 + $0xc0] ss:$8 sps:$4 sm:$0xff]   ;;  %vm2624_vm3 = vmor %vm1584_vm2, %vm1583_vm1 }
  0x13   :  { %709 = vmatpush1.bf16.msra.mxu1 %v1800_v18  ;;  %v1849_v53 = vld [vmem:[%s2736_s1 + $0x1c0] ss:$8 sps:$4 sm:$0xff]   ;;  %v1852_v55 = vld [vmem:[%s2736_s1 + $0x1d4] ss:$8 sps:$4 sm:$0xff]   ;;  %v1854_v56 = vld [vmem:[%s2736_s1 + $0xd0] ss:$8 sps:$4 sm:$0xff]  }
  0x14   :  { %822 = vmatpush1.bf16.msra.mxu0 %v1801_v19  ;;  %710 = vmatprep.subr.bf16.mxu1 %v1802_v20  ;;  %1868 = vpow2.f32 %v1606_v47  ;;  %v1855_v57 = vld [vmem:[%s2736_s1 + $0x1d0] ss:$8 sps:$4 sm:$0xff]   ;;  %v1856_v58 = vld [vmem:[%s2736_s1 + $0xe4] ss:$8 sps:$4 sm:$0xff]   ;;  %v1860_v61 = vld [vmem:[%s2736_s1 + $0xe0] ss:$8 sps:$4 sm:$0xff]  }
  0x15   :  { %823 = vmatprep.subr.bf16.mxu0 %v1804_v21  ;;  %v1858_v59 = vld [vmem:[%s2736_s1 + $0x1e4] ss:$8 sps:$4 sm:$0xff]   ;;  %v1861_v62 = vld [vmem:[%s2736_s1 + $0x1e0] ss:$8 sps:$4 sm:$0xff]   ;;  %v1862_v0 = vld [vmem:[%s2736_s1 + $0xf4] ss:$8 sps:$4 sm:$0xff]  }
  0x16   :  { %v1864_v1 = vld [vmem:[%s2736_s1 + $0x1f4] ss:$8 sps:$4 sm:$0xff]   ;;  %v1866_v3 = vld [vmem:[%s2736_s1 + $0xf0] ss:$8 sps:$4 sm:$0xff]   ;;  %v61_v5 = vshrl.u32 %v60_v2, 7 }
  0x17   :  { %711 = vmatpush1.bf16.msra.mxu1 %v1806_v22  ;;  %v1867_v4 = vld [vmem:[%s2736_s1 + $0x1f0] ss:$8 sps:$4 sm:$0xff]  }
  0x18   :  { %824 = vmatpush1.bf16.msra.mxu0 %v1807_v23  ;;  %712 = vmatprep.subr.bf16.mxu1 %v1808_v24  ;;  %v62_v6 = vsub.s32 0, %v61_v5  ;;  %v66_v7 = vsub.s32 1, %v61_v5  ;;  %v70_v8 = vsub.s32 2, %v61_v5  ;;  %v74_v9 = vsub.s32 3, %v61_v5  ;;  %v27_v23 = vld [vmem:[%s2738_s2] sm:$0xff]  ;;  %v29_v24 = vld [vmem:[%s2738_s2 + $0x10] sm:$0xff] }
  0x19   :  { %825 = vmatprep.subr.bf16.mxu0 %v1810_v25  ;;  %v42_v2 = vld [vmem:[%s2738_s2 + $0x78] sm:$0xff] }
  0x1b   :  { %713 = vmatpush1.bf16.msra.mxu1 %v1812_v26 }
  0x1c   :  { %826 = vmatpush1.bf16.msra.mxu0 %v1813_v27  ;;  %714 = vmatprep.subr.bf16.mxu1 %v1814_v28 }
  0x1d   :  { %827 = vmatprep.subr.bf16.mxu0 %v1816_v29  ;;  %v28_v29 = vld [vmem:[%s2738_s2 + $0x8] sm:$0xff] }
  0x1e   :  { %v1869_v60 = vpop.eup %1868 }
  0x1f   :  { %715 = vmatpush1.bf16.msra.mxu1 %v1818_v30  ;;  %v24_v63 = vadd.f32 1.0, %v1869_v60  ;;  %v30_v30 = vld [vmem:[%s2738_s2 + $0x18] sm:$0xff] }
  0x20   :  { %828 = vmatpush1.bf16.msra.mxu0 %v1819_v31  ;;  %716 = vmatprep.subr.bf16.mxu1 %v1820_v32  ;;  %v31_v31 = vld [vmem:[%s2738_s2 + $0x20] sm:$0xff] }
  0x21   :  { %829 = vmatprep.subr.bf16.mxu0 %v1822_v33  ;;  %1870 = vrcp.f32 %v24_v63  ;;  %v39_v63 = vld [vmem:[%s2738_s2 + $0x60] sm:$0xff] }
  0x23   :  { %717 = vmatpush1.bf16.msra.mxu1 %v1824_v34  ;;  %v33_v34 = vld [vmem:[%s2738_s2 + $0x30] sm:$0xff] }
  0x24   :  { %830 = vmatpush1.bf16.msra.mxu0 %v1825_v35  ;;  %718 = vmatprep.subr.bf16.mxu1 %v1826_v36  ;;  %v32_v35 = vld [vmem:[%s2738_s2 + $0x28] sm:$0xff]  ;;  %v34_v36 = vld [vmem:[%s2738_s2 + $0x38] sm:$0xff] }
  0x25   :  { %831 = vmatprep.subr.bf16.mxu0 %v1828_v37 }
  0x27   :  { %719 = vmatpush1.bf16.msra.mxu1 %v1830_v38 }
  0x28   :  { %832 = vmatpush1.bf16.msra.mxu0 %v1831_v39  ;;  %720 = vmatprep.subr.bf16.mxu1 %v1832_v40 }
  0x29   :  { %833 = vmatprep.subr.bf16.mxu0 %v1834_v41 }
  0x2b   :  { %721 = vmatpush1.bf16.msra.mxu1 %v1836_v42  ;;  %v1871_v10 = vpop.eup %1870 }
  0x2c   :  { %834 = vmatpush1.bf16.msra.mxu0 %v1837_v43  ;;  %722 = vmatprep.subr.bf16.mxu1 %v1838_v44  ;;  %v63_v11 = vrot.slane %v1871_v10, %v62_v6  ;;  %v67_v12 = vrot.slane %v1871_v10, %v66_v7  ;;  %v71_v13 = vrot.slane %v1871_v10, %v70_v8 }
  0x2d   :  { %835 = vmatprep.subr.bf16.mxu0 %v1840_v45  ;;  %v75_v14 = vrot.slane %v1871_v10, %v74_v9 }
  0x2e   :  { %v80_v15 = vpack.c.bf16 %v63_v11, %v63_v11  ;;  %v81_v16 = vpack.c.bf16 %v67_v12, %v67_v12  ;;  %v82_v17 = vpack.c.bf16 %v71_v13, %v71_v13  ;;  %v43_v11 = vld [vmem:[%s2738_s2 + $0x80] sm:$0xff]  ;;  %v45_v12 = vld [vmem:[%s2738_s2 + $0x90] sm:$0xff]  ;;  %v44_v13 = vld [vmem:[%s2738_s2 + $0x88] sm:$0xff] }
  0x2f   :  { %723 = vmatpush1.bf16.msra.mxu1 %v1842_v48  ;;  %v83_v18 = vpack.c.bf16 %v75_v14, %v75_v14  ;;  %v46_v14 = vld [vmem:[%s2738_s2 + $0x98] sm:$0xff] }
  0x30   :  { %836 = vmatpush1.bf16.msra.mxu0 %v1843_v49  ;;  %724 = vmatprep.subr.bf16.mxu1 %v1844_v50  ;;  %v85_v19 = vpack.i.b16 %v80_v15, %v80_v15  ;;  %v92_v20 = vpack.i.b16 %v81_v16, %v81_v16  ;;  %v99_v21 = vpack.i.b16 %v82_v17, %v82_v17  ;;  %v35_v49 = vld [vmem:[%s2738_s2 + $0x40] sm:$0xff] }
  0x31   :  { %837 = vmatprep.subr.bf16.mxu0 %v1846_v51  ;;  %v106_v22 = vpack.i.b16 %v83_v18, %v83_v18 }
  0x32   :  { %v90_v25 = vrot.slane %v85_v19, %v62_v6  ;;  %v97_v26 = vrot.slane %v92_v20, %v62_v6  ;;  %v104_v27 = vrot.slane %v99_v21, %v62_v6 }
  0x33   :  { %725 = vmatpush1.bf16.msra.mxu1 %v1848_v52  ;;  %v111_v28 = vrot.slane %v106_v22, %v62_v6  ;;  %v37_v52 = vld [vmem:[%s2738_s2 + $0x50] sm:$0xff] }
  0x34   :  { %838 = vmatpush1.bf16.msra.mxu0 %v1849_v53  ;;  %726 = vmatprep.subr.bf16.mxu1 %v1850_v54  ;;  %v2145_v32 = vcombine.low %v90_v25, %v97_v26  ;;  %v36_v53 = vld [vmem:[%s2738_s2 + $0x48] sm:$0xff]  ;;  %v38_v54 = vld [vmem:[%s2738_s2 + $0x58] sm:$0xff] }
  0x35   :  { %839 = vmatprep.subr.bf16.mxu0 %v1852_v55  ;;  %v2147_v33 = vcombine.low %v104_v27, %v111_v28  ;;  %v48_v25 = vld [vmem:[%s2738_s2 + $0xa8] sm:$0xff]  ;;  %v50_v26 = vld [vmem:[%s2738_s2 + $0xb8] sm:$0xff] }
  0x36   :  { %v124_v37 = vmul.bf16 %v2145_v32, %v27_v23  ;;  %v126_v38 = vmul.bf16 %v2145_v32, %v29_v24  ;;  %v128_v41 = vmul.bf16 %v2145_v32, %v31_v31  ;;  %v130_v42 = vmul.bf16 %v2145_v32, %v33_v34  ;;  %v47_v23 = vld [vmem:[%s2738_s2 + $0xa0] sm:$0xff]  ;;  %v49_v24 = vld [vmem:[%s2738_s2 + $0xb0] sm:$0xff] }
  0x37   :  { %727 = vmatpush1.bf16.msra.mxu1 %v1854_v56  ;;  %v125_v39 = vmul.bf16 %v2147_v33, %v28_v29  ;;  %v127_v40 = vmul.bf16 %v2147_v33, %v30_v30  ;;  %v129_v43 = vmul.bf16 %v2147_v33, %v32_v35  ;;  %v131_v44 = vmul.bf16 %v2147_v33, %v34_v36 }
  0x38   :  { %840 = vmatpush1.bf16.msra.mxu0 %v1855_v57  ;;  %728 = vmatprep.subr.bf16.mxu1 %v1856_v58  ;;  %v1610_v45 = vcombine.high %v124_v37, %v126_v38  ;;  %v1609_v47 = vcombine.low %v124_v37, %v126_v38  ;;  %v1614_v50 = vcombine.high %v128_v41, %v130_v42  ;;  %v51_v37 = vld [vmem:[%s2738_s2 + $0xc0] sm:$0xff]  ;;  %v53_v38 = vld [vmem:[%s2738_s2 + $0xd0] sm:$0xff] }
  0x39   :  { %841 = vmatprep.subr.bf16.mxu0 %v1858_v59  ;;  %v1612_v46 = vcombine.high %v125_v39, %v127_v40  ;;  %v1611_v48 = vcombine.low %v125_v39, %v127_v40  ;;  %v1616_v51 = vcombine.high %v129_v43, %v131_v44  ;;  %v132_v55 = vmul.bf16 %v2145_v32, %v35_v49  ;;  %v52_v39 = vld [vmem:[%s2738_s2 + $0xc8] sm:$0xff]  ;;  %v54_v40 = vld [vmem:[%s2738_s2 + $0xd8] sm:$0xff]  ;;  %v55_v49 = vld [vmem:[%s2738_s2 + $0xe0] sm:$0xff] }
  0x3a   :  { %732 = vmatprep.mubr.bf16.mxu1 %v1610_v45  ;;  %v134_v56 = vmul.bf16 %v2145_v32, %v37_v52  ;;  %v133_v57 = vmul.bf16 %v2147_v33, %v36_v53  ;;  %v135_v58 = vmul.bf16 %v2147_v33, %v38_v54  ;;  %v1613_v59 = vcombine.low %v128_v41, %v130_v42  ;;  %v58_v52 = vld [vmem:[%s2738_s2 + $0xf8] sm:$0xff] }
  0x3b   :  { %729 = vmatpush1.bf16.msra.mxu1 %v1860_v61  ;;  %845 = vmatprep.mubr.bf16.mxu0 %v1612_v46  ;;  %v1615_v60 = vcombine.low %v129_v43, %v131_v44  ;;  %v139_v6 = vmul.bf16 %v2147_v33, %v42_v2  ;;  %v140_v15 = vmul.bf16 %v2145_v32, %v43_v11 }
  0x3c   :  { %842 = vmatpush1.bf16.msra.mxu0 %v1861_v62  ;;  %730 = vmatprep.subr.bf16.mxu1 %v1862_v0  ;;  %v1618_v61 = vcombine.high %v132_v55, %v134_v56  ;;  %v1620_v62 = vcombine.high %v133_v57, %v135_v58  ;;  %v41_v0 = vld [vmem:[%s2738_s2 + $0x70] sm:$0xff]  ;;  %v1617_v7 = vcombine.low %v132_v55, %v134_v56 }
  0x3d   :  { %843 = vmatprep.subr.bf16.mxu0 %v1864_v1  ;;  %v40_v1 = vld [vmem:[%s2738_s2 + $0x68] sm:$0xff]  ;;  %v1619_v8 = vcombine.low %v133_v57, %v135_v58  ;;  %v142_v16 = vmul.bf16 %v2145_v32, %v45_v12  ;;  %v141_v17 = vmul.bf16 %v2147_v33, %v44_v13  ;;  %v143_v18 = vmul.bf16 %v2147_v33, %v46_v14 }
  0x3e   :  { %v137_v5 = vmul.bf16 %v2147_v33, %v40_v1  ;;  %v144_v27 = vmul.bf16 %v2145_v32, %v47_v23  ;;  %v146_v28 = vmul.bf16 %v2145_v32, %v49_v24  ;;  %v145_v29 = vmul.bf16 %v2147_v33, %v48_v25 }
  0x3f   :  { %731 = vmatpush1.bf16.msra.mxu1 %v1866_v3  ;;  %v136_v3 = vmul.bf16 %v2145_v32, %v39_v63  ;;  %v1626_v21 = vcombine.high %v140_v15, %v142_v16  ;;  %v1628_v22 = vcombine.high %v141_v17, %v143_v18  ;;  %v147_v30 = vmul.bf16 %v2147_v33, %v50_v26 }
  0x40   :  { %844 = vmatpush1.bf16.msra.mxu0 %v1867_v4  ;;  %v138_v4 = vmul.bf16 %v2145_v32, %v41_v0  ;;  %v1624_v10 = vcombine.high %v137_v5, %v139_v6  ;;  %v1623_v20 = vcombine.low %v137_v5, %v139_v6  ;;  %v1625_v31 = vcombine.low %v140_v15, %v142_v16 }
  0x41   :  { %v1627_v34 = vcombine.low %v141_v17, %v143_v18  ;;  %v1630_v35 = vcombine.high %v144_v27, %v146_v28  ;;  %v1632_v36 = vcombine.high %v145_v29, %v147_v30  ;;  %v148_v41 = vmul.bf16 %v2145_v32, %v51_v37 }
  0x42   :  { %733 = vmatmul.mubr.bf16.vlgmr.msra.gmra.mrb[0].mxu1 %v1609_v47  ;;  %v1622_v9 = vcombine.high %v136_v3, %v138_v4  ;;  %v1621_v19 = vcombine.low %v136_v3, %v138_v4  ;;  %v150_v42 = vmul.bf16 %v2145_v32, %v53_v38  ;;  %v149_v43 = vmul.bf16 %v2147_v33, %v52_v39 }
  0x43   :  { %846 = vmatmul.mubr.bf16.vlgmr.msra.gmra.mrb[0].mxu0 %v1611_v48  ;;  %742 = vmatprep.mubr.bf16.mxu1 %v1614_v50  ;;  %v151_v44 = vmul.bf16 %v2147_v33, %v54_v40  ;;  %v1629_v45 = vcombine.low %v144_v27, %v146_v28  ;;  %v1631_v46 = vcombine.low %v145_v29, %v147_v30  ;;  %v57_v50 = vld [vmem:[%s2738_s2 + $0xf0] sm:$0xff] }
  0x44   :  { %855 = vmatprep.mubr.bf16.mxu0 %v1616_v51  ;;  %v1634_v47 = vcombine.high %v148_v41, %v150_v42  ;;  %v56_v51 = vld [vmem:[%s2738_s2 + $0xe8] sm:$0xff]  ;;  %v152_v53 = vmul.bf16 %v2145_v32, %v55_v49  ;;  %v154_v54 = vmul.bf16 %v2145_v32, %v57_v50  ;;  %v155_v56 = vmul.bf16 %v2147_v33, %v58_v52 }
  0x45   :  { %v1636_v48 = vcombine.high %v149_v43, %v151_v44  ;;  %v153_v55 = vmul.bf16 %v2147_v33, %v56_v51  ;;  %v1633_v57 = vcombine.low %v148_v41, %v150_v42  ;;  %v1635_v58 = vcombine.low %v149_v43, %v151_v44 }
  0x4a   :  { %743 = vmatmul.mubr.bf16.gmra.mrb[4].mxu1 %v1613_v59  ;;  %v1638_v59 = vcombine.high %v152_v53, %v154_v54 }
  0x4b   :  { %856 = vmatmul.mubr.bf16.gmra.mrb[4].mxu0 %v1615_v60  ;;  %752 = vmatprep.mubr.bf16.mxu1 %v1618_v61  ;;  %v1640_v60 = vcombine.high %v153_v55, %v155_v56  ;;  %v1637_v61 = vcombine.low %v152_v53, %v154_v54 }
  0x4c   :  { %865 = vmatprep.mubr.bf16.mxu0 %v1620_v62  ;;  %v1639_v62 = vcombine.low %v153_v55, %v155_v56 }
  0x52   :  { %753 = vmatmul.mubr.bf16.gmra.mrb[8].mxu1 %v1617_v7 }
  0x53   :  { %866 = vmatmul.mubr.bf16.gmra.mrb[8].mxu0 %v1619_v8  ;;  %762 = vmatprep.mubr.bf16.mxu1 %v1622_v9 }
  0x54   :  { %875 = vmatprep.mubr.bf16.mxu0 %v1624_v10 }
  0x5a   :  { %763 = vmatmul.mubr.bf16.gmra.mrb[12].mxu1 %v1621_v19 }
  0x5b   :  { %876 = vmatmul.mubr.bf16.gmra.mrb[12].mxu0 %v1623_v20  ;;  %772 = vmatprep.mubr.bf16.mxu1 %v1626_v21 }
  0x5c   :  { %885 = vmatprep.mubr.bf16.mxu0 %v1628_v22 }
  0x62   :  { %773 = vmatmul.mubr.bf16.gmra.mrb[16].mxu1 %v1625_v31 }
  0x63   :  { %886 = vmatmul.mubr.bf16.gmra.mrb[16].mxu0 %v1627_v34  ;;  %782 = vmatprep.mubr.bf16.mxu1 %v1630_v35 }
  0x64   :  { %895 = vmatprep.mubr.bf16.mxu0 %v1632_v36 }
  0x6a   :  { %783 = vmatmul.mubr.bf16.gmra.mrb[20].mxu1 %v1629_v45 }
  0x6b   :  { %896 = vmatmul.mubr.bf16.gmra.mrb[20].mxu0 %v1631_v46  ;;  %792 = vmatprep.mubr.bf16.mxu1 %v1634_v47 }
  0x6c   :  { %905 = vmatprep.mubr.bf16.mxu0 %v1636_v48 }
  0x72   :  { %793 = vmatmul.mubr.bf16.gmra.mrb[24].mxu1 %v1633_v57 }
  0x73   :  { %906 = vmatmul.mubr.bf16.gmra.mrb[24].mxu0 %v1635_v58  ;;  %802 = vmatprep.mubr.bf16.mxu1 %v1638_v59 }
  0x74   :  { %915 = vmatprep.mubr.bf16.mxu0 %v1640_v60 }
  0x7a   :  { %803 = vmatmul.mubr.bf16.gmra.mrb[28].mxu1 %v1637_v61 }
  0x7b   :  { %916 = vmatmul.mubr.bf16.gmra.mrb[28].mxu0 %v1639_v62 }
 0x115   :  { %v734_v63 = vpop.f32.mrb[0].mxu1 }
 0x116   :  { %v847_v0 = vpop.f32.mrb[0].mxu0  ;;  %v736_v32 = vpop.f32.mrb[1].mxu1 }
 0x117   :  { %v2262_v1 = vadd.f32 %v847_v0, %v734_v63  ;;  %v849_v2 = vpop.f32.mrb[1].mxu0  ;;  %v738_v3 = vpop.f32.mrb[2].mxu1 }
 0x118   :  { %v2264_v33 = vadd.f32 %v849_v2, %v736_v32  ;;  %v851_v4 = vpop.f32.mrb[2].mxu0  ;;  %v740_v6 = vpop.f32.mrb[3].mxu1 }
 0x119   :  { %v2266_v5 = vadd.f32 %v851_v4, %v738_v3  ;;  %v853_v7 = vpop.f32.mrb[3].mxu0  ;;  %v1007_v30 = vmul.f32 %v2262_v1, %v2262_v1 }
 0x11a   :  { %v2268_v8 = vadd.f32 %v853_v7, %v740_v6  ;;  %v927_v9 = vsel %vm926_vm0, %v2264_v33, 0.0  ;;  %v1008_v13 = vmul.f32 %v2264_v33, %v2264_v33 }
 0x11b   :  { %v928_v10 = vadd.f32 %v927_v9, %v2262_v1  ;;  %v1009_v14 = vmul.f32 %v2266_v5, %v2266_v5 }
 0x11c   :  { %v1010_v11 = vmul.f32 %v2268_v8, %v2268_v8  ;;  %v931_v12 = vsel %vm926_vm0, %v2268_v8, 0.0  ;;  %v1039_v26 = vsel %vm926_vm0, %v1008_v13, 0.0 }
 0x11d   :  { %929 = vadd.xlane.f32.xlu0 %v928_v10  ;;  %v744_v15 = vpop.f32.mrb[4].mxu1  ;;  %v932_v22 = vadd.f32 %v931_v12, %v2266_v5  ;;  %v1040_v37 = vadd.f32 %v1039_v26, %v1007_v30 }
 0x11e   :  { %v857_v16 = vpop.f32.mrb[4].mxu0  ;;  %v1043_v17 = vsel %vm926_vm0, %v1010_v11, 0.0  ;;  %v746_v19 = vpop.f32.mrb[5].mxu1 }
 0x11f   :  { %v2282_v18 = vadd.f32 %v857_v16, %v744_v15  ;;  %v859_v20 = vpop.f32.mrb[5].mxu0  ;;  %v1044_v21 = vadd.f32 %v1043_v17, %v1009_v14  ;;  %v748_v24 = vpop.f32.mrb[6].mxu1 }
 0x120   :  { %v2285_v23 = vadd.f32 %v859_v20, %v746_v19  ;;  %v861_v25 = vpop.f32.mrb[6].mxu0  ;;  %v750_v29 = vpop.f32.mrb[7].mxu1 }
 0x121   :  { %v2288_v27 = vadd.f32 %v861_v25, %v748_v24  ;;  %v863_v28 = vpop.f32.mrb[7].mxu0  ;;  %1045 = vadd.xlane.f32.xlu1 %v1044_v21  ;;  %933 = vadd.xlane.f32.xlu0 %v932_v22  ;;  %v1011_v31 = vmul.f32 %v2282_v18, %v2282_v18 }
 0x122   :  { %v2294_v34 = vadd.f32 %v863_v28, %v750_v29  ;;  %v935_v35 = vsel %vm926_vm0, %v2285_v23, 0.0  ;;  %v1012_v36 = vmul.f32 %v2285_v23, %v2285_v23 }
 0x123   :  { %v936_v38 = vadd.f32 %v935_v35, %v2282_v18  ;;  %v1013_v49 = vmul.f32 %v2288_v27, %v2288_v27 }
 0x124   :  { %v1047_v39 = vsel %vm926_vm0, %v1012_v36, 0.0  ;;  %v939_v40 = vsel %vm926_vm0, %v2294_v34, 0.0  ;;  %v1014_v41 = vmul.f32 %v2294_v34, %v2294_v34 }
 0x125   :  { %1041 = vadd.xlane.f32.xlu0 %v1040_v37  ;;  %937 = vadd.xlane.f32.xlu1 %v936_v38  ;;  %v1048_v42 = vadd.f32 %v1047_v39, %v1011_v31  ;;  %v754_v43 = vpop.f32.mrb[8].mxu1  ;;  %v940_v48 = vadd.f32 %v939_v40, %v2288_v27 }
 0x126   :  { %v867_v44 = vpop.f32.mrb[8].mxu0  ;;  %v756_v46 = vpop.f32.mrb[9].mxu1  ;;  %v1051_v53 = vsel %vm926_vm0, %v1014_v41, 0.0 }
 0x127   :  { %v2306_v45 = vadd.f32 %v867_v44, %v754_v43  ;;  %v869_v47 = vpop.f32.mrb[9].mxu0  ;;  %v758_v51 = vpop.f32.mrb[10].mxu1  ;;  %v1052_v61 = vadd.f32 %v1051_v53, %v1013_v49 }
 0x128   :  { %v2311_v50 = vadd.f32 %v869_v47, %v756_v46  ;;  %v871_v52 = vpop.f32.mrb[10].mxu0  ;;  %v760_v55 = vpop.f32.mrb[11].mxu1 }
 0x129   :  { %1049 = vadd.xlane.f32.xlu0 %v1048_v42  ;;  %941 = vadd.xlane.f32.xlu1 %v940_v48  ;;  %v2314_v54 = vadd.f32 %v871_v52, %v758_v51  ;;  %v873_v56 = vpop.f32.mrb[11].mxu0  ;;  %v1015_v57 = vmul.f32 %v2306_v45, %v2306_v45 }
 0x12a   :  { %v2318_v58 = vadd.f32 %v873_v56, %v760_v55  ;;  %v943_v59 = vsel %vm926_vm0, %v2311_v50, 0.0  ;;  %v1016_v60 = vmul.f32 %v2311_v50, %v2311_v50 }
 0x12b   :  { %v944_v62 = vadd.f32 %v943_v59, %v2306_v45  ;;  %v1017_v4 = vmul.f32 %v2314_v54, %v2314_v54 }
 0x12c   :  { %v1055_v63 = vsel %vm926_vm0, %v1016_v60, 0.0  ;;  %v947_v0 = vsel %vm926_vm0, %v2318_v58, 0.0  ;;  %v1018_v32 = vmul.f32 %v2318_v58, %v2318_v58 }
 0x12d   :  { %1053 = vadd.xlane.f32.xlu1 %v1052_v61  ;;  %945 = vadd.xlane.f32.xlu0 %v944_v62  ;;  %v1056_v2 = vadd.f32 %v1055_v63, %v1015_v57  ;;  %v948_v3 = vadd.f32 %v947_v0, %v2314_v54  ;;  %v764_v6 = vpop.f32.mrb[12].mxu1 }
 0x12e   :  { %v877_v7 = vpop.f32.mrb[12].mxu0  ;;  %v1059_v9 = vsel %vm926_vm0, %v1018_v32, 0.0  ;;  %v766_v11 = vpop.f32.mrb[13].mxu1 }
 0x12f   :  { %v2334_v10 = vadd.f32 %v877_v7, %v764_v6  ;;  %v879_v12 = vpop.f32.mrb[13].mxu0  ;;  %v768_v14 = vpop.f32.mrb[14].mxu1  ;;  %v1060_v20 = vadd.f32 %v1059_v9, %v1017_v4 }
 0x130   :  { %v2336_v13 = vadd.f32 %v879_v12, %v766_v11  ;;  %v881_v15 = vpop.f32.mrb[14].mxu0  ;;  %v770_v17 = vpop.f32.mrb[15].mxu1 }
 0x131   :  { %1057 = vadd.xlane.f32.xlu0 %v1056_v2  ;;  %949 = vadd.xlane.f32.xlu1 %v948_v3  ;;  %v2338_v16 = vadd.f32 %v881_v15, %v768_v14  ;;  %v883_v19 = vpop.f32.mrb[15].mxu0  ;;  %v1019_v21 = vmul.f32 %v2334_v10, %v2334_v10 }
 0x132   :  { %v2342_v22 = vadd.f32 %v883_v19, %v770_v17  ;;  %v951_v24 = vsel %vm926_vm0, %v2336_v13, 0.0  ;;  %v1020_v25 = vmul.f32 %v2336_v13, %v2336_v13 }
 0x133   :  { %v952_v26 = vadd.f32 %v951_v24, %v2334_v10  ;;  %v1021_v36 = vmul.f32 %v2338_v16, %v2338_v16 }
 0x134   :  { %v1063_v28 = vsel %vm926_vm0, %v1020_v25, 0.0  ;;  %v955_v29 = vsel %vm926_vm0, %v2342_v22, 0.0  ;;  %v1022_v30 = vmul.f32 %v2342_v22, %v2342_v22 }
 0x135   :  { %1061 = vadd.xlane.f32.xlu1 %v1060_v20  ;;  %953 = vadd.xlane.f32.xlu0 %v952_v26  ;;  %v1064_v31 = vadd.f32 %v1063_v28, %v1019_v21  ;;  %v956_v35 = vadd.f32 %v955_v29, %v2338_v16  ;;  %v774_v37 = vpop.f32.mrb[16].mxu1  ;;  %v1904_v28 = vmov 0  }
 0x136   :  { %v887_v38 = vpop.f32.mrb[16].mxu0  ;;  %v1067_v39 = vsel %vm926_vm0, %v1022_v30, 0.0  ;;  %v776_v41 = vpop.f32.mrb[17].mxu1  ;;  %1771 = vset.pattern.permute.xlu1 %v1904_v28  ;;  %1770 = vset.pattern.permute.xlu0 %v1904_v28 }
 0x137   :  { %v2358_v40 = vadd.f32 %v887_v38, %v774_v37  ;;  %v889_v42 = vpop.f32.mrb[17].mxu0  ;;  %v778_v44 = vpop.f32.mrb[18].mxu1  ;;  %v1068_v51 = vadd.f32 %v1067_v39, %v1021_v36 }
 0x138   :  { %v2360_v43 = vadd.f32 %v889_v42, %v776_v41  ;;  %v891_v46 = vpop.f32.mrb[18].mxu0  ;;  %v780_v48 = vpop.f32.mrb[19].mxu1 }
 0x139   :  { %1065 = vadd.xlane.f32.xlu0 %v1064_v31  ;;  %957 = vadd.xlane.f32.xlu1 %v956_v35  ;;  %v2362_v47 = vadd.f32 %v891_v46, %v778_v44  ;;  %v893_v49 = vpop.f32.mrb[19].mxu0  ;;  %v1023_v52 = vmul.f32 %v2358_v40, %v2358_v40 }
 0x13a   :  { %v2366_v53 = vadd.f32 %v893_v49, %v780_v48  ;;  %v959_v55 = vsel %vm926_vm0, %v2360_v43, 0.0  ;;  %v1024_v56 = vmul.f32 %v2360_v43, %v2360_v43 }
 0x13b   :  { %v960_v57 = vadd.f32 %v959_v55, %v2358_v40  ;;  %v1025_v0 = vmul.f32 %v2362_v47, %v2362_v47 }
 0x13c   :  { %v1071_v59 = vsel %vm926_vm0, %v1024_v56, 0.0  ;;  %v963_v60 = vsel %vm926_vm0, %v2366_v53, 0.0  ;;  %v1026_v61 = vmul.f32 %v2366_v53, %v2366_v53 }
 0x13d   :  { %1069 = vadd.xlane.f32.xlu1 %v1068_v51  ;;  %961 = vadd.xlane.f32.xlu0 %v960_v57  ;;  %v1072_v62 = vadd.f32 %v1071_v59, %v1023_v52  ;;  %v964_v63 = vadd.f32 %v963_v60, %v2362_v47  ;;  %v784_v32 = vpop.f32.mrb[20].mxu1 }
 0x13e   :  { %v897_v2 = vpop.f32.mrb[20].mxu0  ;;  %v1075_v3 = vsel %vm926_vm0, %v1026_v61, 0.0  ;;  %v786_v6 = vpop.f32.mrb[21].mxu1 }
 0x13f   :  { %v2382_v4 = vadd.f32 %v897_v2, %v784_v32  ;;  %v899_v7 = vpop.f32.mrb[21].mxu0  ;;  %v788_v11 = vpop.f32.mrb[22].mxu1  ;;  %v1076_v19 = vadd.f32 %v1075_v3, %v1025_v0 }
 0x140   :  { %v2384_v9 = vadd.f32 %v899_v7, %v786_v6  ;;  %v901_v12 = vpop.f32.mrb[22].mxu0  ;;  %v790_v15 = vpop.f32.mrb[23].mxu1 }
 0x141   :  { %1073 = vadd.xlane.f32.xlu0 %v1072_v62  ;;  %965 = vadd.xlane.f32.xlu1 %v964_v63  ;;  %v2386_v14 = vadd.f32 %v901_v12, %v788_v11  ;;  %v903_v17 = vpop.f32.mrb[23].mxu0  ;;  %v1027_v20 = vmul.f32 %v2382_v4, %v2382_v4 }
 0x142   :  { %v2390_v21 = vadd.f32 %v903_v17, %v790_v15  ;;  %v967_v24 = vsel %vm926_vm0, %v2384_v9, 0.0  ;;  %v1028_v25 = vmul.f32 %v2384_v9, %v2384_v9 }
 0x143   :  { %v968_v26 = vadd.f32 %v967_v24, %v2382_v4  ;;  %v1029_v37 = vmul.f32 %v2386_v14, %v2386_v14 }
 0x144   :  { %v1079_v29 = vsel %vm926_vm0, %v1028_v25, 0.0  ;;  %v971_v30 = vsel %vm926_vm0, %v2390_v21, 0.0  ;;  %v1030_v31 = vmul.f32 %v2390_v21, %v2390_v21 }
 0x145   :  { %1077 = vadd.xlane.f32.xlu1 %v1076_v19  ;;  %969 = vadd.xlane.f32.xlu0 %v968_v26  ;;  %v1080_v35 = vadd.f32 %v1079_v29, %v1027_v20  ;;  %v972_v36 = vadd.f32 %v971_v30, %v2386_v14  ;;  %v794_v38 = vpop.f32.mrb[24].mxu1 }
 0x146   :  { %v907_v39 = vpop.f32.mrb[24].mxu0  ;;  %v1083_v41 = vsel %vm926_vm0, %v1030_v31, 0.0  ;;  %v796_v44 = vpop.f32.mrb[25].mxu1 }
 0x147   :  { %v2406_v42 = vadd.f32 %v907_v39, %v794_v38  ;;  %v909_v46 = vpop.f32.mrb[25].mxu0  ;;  %v798_v49 = vpop.f32.mrb[26].mxu1  ;;  %v1084_v57 = vadd.f32 %v1083_v41, %v1029_v37 }
 0x148   :  { %v2408_v48 = vadd.f32 %v909_v46, %v796_v44  ;;  %v911_v51 = vpop.f32.mrb[26].mxu0  ;;  %v800_v55 = vpop.f32.mrb[27].mxu1 }
 0x149   :  { %1081 = vadd.xlane.f32.xlu0 %v1080_v35  ;;  %973 = vadd.xlane.f32.xlu1 %v972_v36  ;;  %v2410_v52 = vadd.f32 %v911_v51, %v798_v49  ;;  %v913_v56 = vpop.f32.mrb[27].mxu0  ;;  %v1031_v59 = vmul.f32 %v2406_v42, %v2406_v42 }
 0x14a   :  { %v2414_v60 = vadd.f32 %v913_v56, %v800_v55  ;;  %v975_v61 = vsel %vm926_vm0, %v2408_v48, 0.0  ;;  %v1032_v62 = vmul.f32 %v2408_v48, %v2408_v48 }
 0x14b   :  { %v976_v63 = vadd.f32 %v975_v61, %v2406_v42  ;;  %v1033_v7 = vmul.f32 %v2410_v52, %v2410_v52 }
 0x14c   :  { %v1087_v0 = vsel %vm926_vm0, %v1032_v62, 0.0  ;;  %v979_v32 = vsel %vm926_vm0, %v2414_v60, 0.0  ;;  %v1034_v2 = vmul.f32 %v2414_v60, %v2414_v60 }
 0x14d   :  { %1085 = vadd.xlane.f32.xlu1 %v1084_v57  ;;  %977 = vadd.xlane.f32.xlu0 %v976_v63  ;;  %v1088_v3 = vadd.f32 %v1087_v0, %v1031_v59  ;;  %v980_v6 = vadd.f32 %v979_v32, %v2410_v52  ;;  %v804_v11 = vpop.f32.mrb[28].mxu1 }
 0x14e   :  { %v917_v12 = vpop.f32.mrb[28].mxu0  ;;  %v1091_v15 = vsel %vm926_vm0, %v1034_v2, 0.0  ;;  %v806_v19 = vpop.f32.mrb[29].mxu1 }
 0x14f   :  { %v2430_v17 = vadd.f32 %v917_v12, %v804_v11  ;;  %v919_v20 = vpop.f32.mrb[29].mxu0  ;;  %v808_v25 = vpop.f32.mrb[30].mxu1  ;;  %v1092_v31 = vadd.f32 %v1091_v15, %v1033_v7 }
 0x150   :  { %v2432_v24 = vadd.f32 %v919_v20, %v806_v19  ;;  %v921_v26 = vpop.f32.mrb[30].mxu0  ;;  %v810_v29 = vpop.f32.mrb[31].mxu1 }
 0x151   :  { %1089 = vadd.xlane.f32.xlu0 %v1088_v3  ;;  %981 = vadd.xlane.f32.xlu1 %v980_v6  ;;  %v2434_v28 = vadd.f32 %v921_v26, %v808_v25  ;;  %v923_v30 = vpop.f32.mrb[31].mxu0  ;;  %v1035_v35 = vmul.f32 %v2430_v17, %v2430_v17 }
 0x152   :  { %v2438_v36 = vadd.f32 %v923_v30, %v810_v29  ;;  %v983_v37 = vsel %vm926_vm0, %v2432_v24, 0.0  ;;  %v1036_v38 = vmul.f32 %v2432_v24, %v2432_v24 }
 0x153   :  { %v984_v39 = vadd.f32 %v983_v37, %v2430_v17  ;;  %v1037_v55 = vmul.f32 %v2434_v28, %v2434_v28 }
 0x154   :  { %v1095_v41 = vsel %vm926_vm0, %v1036_v38, 0.0  ;;  %v987_v44 = vsel %vm926_vm0, %v2438_v36, 0.0  ;;  %v1038_v46 = vmul.f32 %v2438_v36, %v2438_v36 }
 0x155   :  { %1093 = vadd.xlane.f32.xlu1 %v1092_v31  ;;  %985 = vadd.xlane.f32.xlu0 %v984_v39  ;;  %v1096_v49 = vadd.f32 %v1095_v41, %v1035_v35  ;;  %v988_v51 = vadd.f32 %v987_v44, %v2434_v28 }
 0x156   :  { %v1099_v56 = vsel %vm926_vm0, %v1038_v46, 0.0 }
 0x157   :  { %v1100_v57 = vadd.f32 %v1099_v56, %v1037_v55  ;;  %v1152_v55 = vld [vmem:[%s2739_s3 + $0x8] sm:$0xff] }
 0x159   :  { %1097 = vadd.xlane.f32.xlu0 %v1096_v49  ;;  %989 = vadd.xlane.f32.xlu1 %v988_v51 }
 0x15d   :  { %1101 = vadd.xlane.f32.xlu1 %v1100_v57 }
 0x1aa   :  { %v930_v59 = vpop.xlane.xlu0 %929 }
 0x1ab   :  { %v991_v63 = vmul.f32 0.0051020407, %v930_v59 }
 0x1ad   :  { %v1119_v7 = vmul.f32 %v991_v63, %v991_v63 }
 0x1ae   :  { %v1046_v61 = vpop.xlane.xlu1 %1045  ;;  %v934_v62 = vpop.xlane.xlu0 %933 }
 0x1af   :  { %v992_v0 = vmul.f32 0.0051020407, %v934_v62  ;;  %v1104_v32 = vmul.f32 0.0051020407, %v1046_v61 }
 0x1b1   :  { %v1120_v2 = vmul.f32 %v992_v0, %v992_v0 }
 0x1b2   :  { %v1042_v3 = vpop.xlane.xlu0 %1041  ;;  %v938_v6 = vpop.xlane.xlu1 %937 }
 0x1b3   :  { %v1136_v11 = vsub.f32 %v1104_v32, %v1120_v2  ;;  %v1103_v12 = vmul.f32 0.0051020407, %v1042_v3  ;;  %v2454_v15 = vmul.f32 0.0051020407, %v938_v6  ;;  %v1151_v6 = vld [vmem:[%s2739_s3] sm:$0xff] }
 0x1b5   :  { %v1168_v19 = vadd.f32 0.001, %v1136_v11  ;;  %v1135_v20 = vsub.f32 %v1103_v12, %v1119_v7  ;;  %v1121_v25 = vmul.f32 %v2454_v15, %v2454_v15 }
 0x1b6   :  { %v1050_v26 = vpop.xlane.xlu0 %1049  ;;  %v942_v29 = vpop.xlane.xlu1 %941 }
 0x1b7   :  { %1872 = vrsqrt.f32 %v1168_v19  ;;  %v1167_v30 = vadd.f32 0.001, %v1135_v20  ;;  %v1105_v31 = vmul.f32 0.0051020407, %v1050_v26  ;;  %v2458_v35 = vmul.f32 0.0051020407, %v942_v29 }
 0x1b9   :  { %1874 = vrsqrt.f32 %v1167_v30  ;;  %v1137_v37 = vsub.f32 %v1105_v31, %v1121_v25  ;;  %v1122_v44 = vmul.f32 %v2458_v35, %v2458_v35  ;;  %v1216_v31 = vld [vmem:[%s2740_s4 + $0x8] sm:$0xff] }
 0x1ba   :  { %v1054_v38 = vpop.xlane.xlu1 %1053  ;;  %v946_v39 = vpop.xlane.xlu0 %945 }
 0x1bb   :  { %v1169_v41 = vadd.f32 0.001, %v1137_v37  ;;  %v1106_v46 = vmul.f32 0.0051020407, %v1054_v38  ;;  %v2462_v49 = vmul.f32 0.0051020407, %v946_v39 }
 0x1bc   :  { %v1215_v37 = vld [vmem:[%s2740_s4] sm:$0xff] }
 0x1bd   :  { %v1138_v51 = vsub.f32 %v1106_v46, %v1122_v44  ;;  %v1123_v56 = vmul.f32 %v2462_v49, %v2462_v49  ;;  %1876 = vrsqrt.f32 %v1169_v41 }
 0x1be   :  { %v1058_v57 = vpop.xlane.xlu0 %1057  ;;  %v950_v59 = vpop.xlane.xlu1 %949 }
 0x1bf   :  { %v1170_v61 = vadd.f32 0.001, %v1138_v51  ;;  %v1107_v62 = vmul.f32 0.0051020407, %v1058_v57  ;;  %v2469_v32 = vmul.f32 0.0051020407, %v950_v59 }
 0x1c1   :  { %v1873_v2 = vpop.eup %1872  ;;  %1878 = vrsqrt.f32 %v1170_v61  ;;  %v1124_v3 = vmul.f32 %v2469_v32, %v2469_v32  ;;  %v1139_v11 = vsub.f32 %v1107_v62, %v1123_v56  ;;  %v1153_v61 = vld [vmem:[%s2739_s3 + $0x10] sm:$0xff] }
 0x1c2   :  { %v1200_v7 = vmul.f32 %v1873_v2, %v1152_v55  ;;  %v1062_v12 = vpop.xlane.xlu1 %1061  ;;  %v954_v19 = vpop.xlane.xlu0 %953 }
 0x1c3   :  { %v1875_v20 = vpop.eup %1874  ;;  %v1108_v25 = vmul.f32 0.0051020407, %v1062_v12  ;;  %v1171_v38 = vadd.f32 0.001, %v1139_v11  ;;  %v2482_v51 = vmul.f32 0.0051020407, %v954_v19 }
 0x1c4   :  { %v1232_v26 = vmul.f32 %v1200_v7, %v992_v0  ;;  %1270 = vperm.xlu1 %1771, %v1200_v7   ;;  %v1199_v29 = vmul.f32 %v1875_v20, %v1151_v6 }
 0x1c5   :  { %v1140_v30 = vsub.f32 %v1108_v25, %v1124_v3  ;;  %v1125_v6 = vmul.f32 %v2482_v51, %v2482_v51  ;;  %v1218_v25 = vld [vmem:[%s2740_s4 + $0x18] sm:$0xff] }
 0x1c6   :  { %v1066_v39 = vpop.xlane.xlu0 %1065  ;;  %v958_v41 = vpop.xlane.xlu1 %957  ;;  %1265 = vperm.xlu0 %1770, %v1199_v29   ;;  %v1231_v44 = vmul.f32 %v1199_v29, %v991_v63  ;;  %v1248_v55 = vsub.f32 %v1216_v31, %v1232_v26  ;;  %v1154_v63 = vld [vmem:[%s2739_s3 + $0x18] sm:$0xff] }
 0x1c7   :  { %v1172_v46 = vadd.f32 0.001, %v1140_v30  ;;  %v2484_v0 = vmul.f32 0.0051020407, %v958_v41  ;;  %v1877_v57 = vpop.eup %1876  ;;  %v1109_v7 = vmul.f32 0.0051020407, %v1066_v39 }
 0x1c8   :  { %v1247_v56 = vsub.f32 %v1215_v37, %v1231_v44  ;;  %v1201_v12 = vmul.f32 %v1877_v57, %v1153_v61 }
 0x1c9   :  { %1880 = vrsqrt.f32 %v1172_v46  ;;  %v1126_v59 = vmul.f32 %v2484_v0, %v2484_v0  ;;  %v1141_v31 = vsub.f32 %v1109_v7, %v1125_v6 }
 0x1ca   :  { %v1070_v62 = vpop.xlane.xlu1 %1069  ;;  %v962_v2 = vpop.xlane.xlu0 %961  ;;  %1382 = vperm.xlu0 %1770, %v1248_v55   ;;  %1377 = vperm.xlu1 %1771, %v1247_v56   ;;  %1882 = vrsqrt.f32 %v1171_v38  ;;  %v1233_v44 = vmul.f32 %v1201_v12, %v2454_v15  ;;  %v1217_v55 = vld [vmem:[%s2740_s4 + $0x10] sm:$0xff] }
 0x1cb   :  { %v1879_v3 = vpop.eup %1878  ;;  %v1110_v11 = vmul.f32 0.0051020407, %v1070_v62  ;;  %v2500_v38 = vmul.f32 0.0051020407, %v962_v2  ;;  %v1173_v61 = vadd.f32 0.001, %v1141_v31 }
 0x1cc   :  { %v1202_v19 = vmul.f32 %v1879_v3, %v1154_v63  ;;  %v1249_v2 = vsub.f32 %v1217_v55, %v1233_v44 }
 0x1cd   :  { %v1142_v20 = vsub.f32 %v1110_v11, %v1126_v59  ;;  %v1127_v15 = vmul.f32 %v2500_v38, %v2500_v38  ;;  %v1220_v11 = vld [vmem:[%s2740_s4 + $0x28] sm:$0xff] }
 0x1ce   :  { %v1074_v26 = vpop.xlane.xlu0 %1073  ;;  %v966_v29 = vpop.xlane.xlu1 %965  ;;  %1275 = vperm.xlu1 %1771, %v1201_v12   ;;  %v1234_v30 = vmul.f32 %v1202_v19, %v2458_v35  ;;  %v1156_v35 = vld [vmem:[%s2739_s3 + $0x28] sm:$0xff]  ;;  %v1155_v12 = vld [vmem:[%s2739_s3 + $0x20] sm:$0xff] }
 0x1cf   :  { %v1174_v37 = vadd.f32 0.001, %v1142_v20  ;;  %v2502_v41 = vmul.f32 0.0051020407, %v966_v29  ;;  %v1111_v63 = vmul.f32 0.0051020407, %v1074_v26 }
 0x1d0   :  { %v1250_v39 = vsub.f32 %v1218_v25, %v1234_v30 }
 0x1d1   :  { %1884 = vrsqrt.f32 %v1174_v37  ;;  %v1128_v46 = vmul.f32 %v2502_v41, %v2502_v41  ;;  %v1143_v29 = vsub.f32 %v1111_v63, %v1127_v15 }
 0x1d2   :  { %v1078_v56 = vpop.xlane.xlu1 %1077  ;;  %v970_v57 = vpop.xlane.xlu0 %969  ;;  %1392 = vperm.xlu0 %1770, %v1250_v39   ;;  %1280 = vperm.xlu1 %1771, %v1202_v19   ;;  %1886 = vrsqrt.f32 %v1173_v61 }
 0x1d3   :  { %v1881_v59 = vpop.eup %1880  ;;  %v1112_v62 = vmul.f32 0.0051020407, %v1078_v56  ;;  %v2521_v19 = vmul.f32 0.0051020407, %v970_v57 }
 0x1d4   :  { %v1204_v3 = vmul.f32 %v1881_v59, %v1156_v35  ;;  %v1883_v6 = vpop.eup %1882  ;;  %v1175_v59 = vadd.f32 0.001, %v1143_v29 }
 0x1d5   :  { %v1144_v7 = vsub.f32 %v1112_v62, %v1128_v46  ;;  %v1203_v39 = vmul.f32 %v1883_v6, %v1155_v12  ;;  %v1158_v46 = vld [vmem:[%s2739_s3 + $0x38] sm:$0xff]  ;;  %v1129_v55 = vmul.f32 %v2521_v19, %v2521_v19  ;;  %v1219_v6 = vld [vmem:[%s2740_s4 + $0x20] sm:$0xff] }
 0x1d6   :  { %v1082_v20 = vpop.xlane.xlu0 %1081  ;;  %v974_v25 = vpop.xlane.xlu1 %973  ;;  %1387 = vperm.xlu1 %1771, %v1249_v2   ;;  %v1236_v26 = vmul.f32 %v1204_v3, %v2469_v32  ;;  %v1222_v2 = vld [vmem:[%s2740_s4 + $0x38] sm:$0xff] }
 0x1d7   :  { %v1176_v30 = vadd.f32 0.001, %v1144_v7  ;;  %v2524_v31 = vmul.f32 0.0051020407, %v974_v25  ;;  %v1113_v35 = vmul.f32 0.0051020407, %v1082_v20  ;;  %v1235_v63 = vmul.f32 %v1203_v39, %v2462_v49 }
 0x1d8   :  { %v1252_v37 = vsub.f32 %v1220_v11, %v1236_v26 }
 0x1d9   :  { %1888 = vrsqrt.f32 %v1176_v30  ;;  %v1130_v44 = vmul.f32 %v2524_v31, %v2524_v31  ;;  %v1145_v7 = vsub.f32 %v1113_v35, %v1129_v55  ;;  %v1251_v30 = vsub.f32 %v1219_v6, %v1235_v63 }
 0x1da   :  { %v1086_v32 = vpop.xlane.xlu1 %1085  ;;  %v978_v56 = vpop.xlane.xlu0 %977  ;;  %1402 = vperm.xlu0 %1770, %v1252_v37   ;;  %1285 = vperm.xlu1 %1771, %v1203_v39   ;;  %1890 = vrsqrt.f32 %v1175_v59 }
 0x1db   :  { %v1885_v57 = vpop.eup %1884  ;;  %v1114_v61 = vmul.f32 0.0051020407, %v1086_v32  ;;  %v2541_v26 = vmul.f32 0.0051020407, %v978_v56 }
 0x1dc   :  { %v1206_v15 = vmul.f32 %v1885_v57, %v1158_v46  ;;  %v1887_v37 = vpop.eup %1886 }
 0x1dd   :  { %v1146_v62 = vsub.f32 %v1114_v61, %v1130_v44  ;;  %v1160_v44 = vld [vmem:[%s2739_s3 + $0x48] sm:$0xff]  ;;  %v1131_v32 = vmul.f32 %v2541_v26, %v2541_v26 }
 0x1de   :  { %v1090_v11 = vpop.xlane.xlu0 %1089  ;;  %v982_v12 = vpop.xlane.xlu1 %981  ;;  %1290 = vperm.xlu1 %1771, %v1204_v3   ;;  %v1238_v20 = vmul.f32 %v1206_v15, %v2484_v0  ;;  %v1157_v0 = vld [vmem:[%s2739_s3 + $0x30] sm:$0xff]  ;;  %v1177_v3 = vadd.f32 0.001, %v1145_v7 }
 0x1df   :  { %v1178_v25 = vadd.f32 0.001, %v1146_v62  ;;  %v2543_v49 = vmul.f32 0.0051020407, %v982_v12  ;;  %v1115_v56 = vmul.f32 0.0051020407, %v1090_v11  ;;  %v1205_v61 = vmul.f32 %v1887_v37, %v1157_v0 }
 0x1e0   :  { %v1254_v29 = vsub.f32 %v1222_v2, %v1238_v20  ;;  %v1224_v62 = vld [vmem:[%s2740_s4 + $0x48] sm:$0xff]  ;;  %v1159_v0 = vld [vmem:[%s2739_s3 + $0x40] sm:$0xff] }
 0x1e1   :  { %1892 = vrsqrt.f32 %v1178_v25  ;;  %v1132_v39 = vmul.f32 %v2543_v49, %v2543_v49  ;;  %v1147_v7 = vsub.f32 %v1115_v56, %v1131_v32 }
 0x1e2   :  { %v1094_v46 = vpop.xlane.xlu1 %1093  ;;  %1412 = vperm.xlu0 %1770, %v1254_v29   ;;  %v986_v55 = vpop.xlane.xlu0 %985  ;;  %1397 = vperm.xlu1 %1771, %v1251_v30   ;;  %1894 = vrsqrt.f32 %v1177_v3  ;;  %v1237_v30 = vmul.f32 %v1205_v61, %v2482_v51 }
 0x1e3   :  { %v1889_v35 = vpop.eup %1888  ;;  %v1116_v57 = vmul.f32 0.0051020407, %v1094_v46  ;;  %v2559_v20 = vmul.f32 0.0051020407, %v986_v55  ;;  %v1179_v46 = vadd.f32 0.001, %v1147_v7 }
 0x1e4   :  { %v1208_v59 = vmul.f32 %v1889_v35, %v1160_v44  ;;  %v1891_v37 = vpop.eup %1890  ;;  %v1162_v44 = vld [vmem:[%s2739_s3 + $0x58] sm:$0xff] }
 0x1e5   :  { %v1148_v63 = vsub.f32 %v1116_v57, %v1132_v39  ;;  %v1133_v55 = vmul.f32 %v2559_v20, %v2559_v20 }
 0x1e6   :  { %1310 = vperm.xlu0 %1770, %v1208_v59   ;;  %1295 = vperm.xlu1 %1771, %v1205_v61   ;;  %v990_v2 = vpop.xlane.xlu1 %989  ;;  %v1240_v6 = vmul.f32 %v1208_v59, %v2502_v41  ;;  %v1098_v11 = vpop.xlane.xlu0 %1097  ;;  %v1221_v41 = vld [vmem:[%s2740_s4 + $0x30] sm:$0xff]  ;;  %v1207_v59 = vmul.f32 %v1891_v37, %v1159_v0 }
 0x1e7   :  { %v1180_v12 = vadd.f32 0.001, %v1148_v63  ;;  %v2561_v25 = vmul.f32 0.0051020407, %v990_v2  ;;  %v1117_v35 = vmul.f32 0.0051020407, %v1098_v11  ;;  %v1253_v57 = vsub.f32 %v1221_v41, %v1237_v30 }
 0x1e8   :  { %v1256_v29 = vsub.f32 %v1224_v62, %v1240_v6  ;;  %v1226_v63 = vld [vmem:[%s2740_s4 + $0x58] sm:$0xff]  ;;  %v1164_v11 = vld [vmem:[%s2739_s3 + $0x68] sm:$0xff] }
 0x1e9   :  { %1896 = vrsqrt.f32 %v1180_v12  ;;  %v1134_v39 = vmul.f32 %v2561_v25, %v2561_v25  ;;  %v1149_v62 = vsub.f32 %v1117_v35, %v1133_v55  ;;  %v1239_v12 = vmul.f32 %v1207_v59, %v2500_v38  ;;  %v1228_v41 = vld [vmem:[%s2740_s4 + $0x68] sm:$0xff]  ;;  %v1225_v55 = vld [vmem:[%s2740_s4 + $0x50] sm:$0xff]  ;;  %v1166_v35 = vld [vmem:[%s2739_s3 + $0x78] sm:$0xff] }
 0x1ea   :  { %1422 = vperm.xlu0 %1770, %v1256_v29   ;;  %1300 = vperm.xlu1 %1771, %v1206_v15   ;;  %v1102_v51 = vpop.xlane.xlu1 %1101  ;;  %1898 = vrsqrt.f32 %v1179_v46  ;;  %v1223_v29 = vld [vmem:[%s2740_s4 + $0x40] sm:$0xff] }
 0x1eb   :  { %v1893_v3 = vpop.eup %1892  ;;  %v1118_v32 = vmul.f32 0.0051020407, %v1102_v51  ;;  %v1181_v37 = vadd.f32 0.001, %v1149_v62 }
 0x1ec   :  { %v1210_v56 = vmul.f32 %v1893_v3, %v1162_v44  ;;  %v1895_v6 = vpop.eup %1894  ;;  %v1255_v44 = vsub.f32 %v1223_v29, %v1239_v12 }
 0x1ed   :  { %v1150_v61 = vsub.f32 %v1118_v32, %v1134_v39  ;;  %v1163_v32 = vld [vmem:[%s2739_s3 + $0x60] sm:$0xff] }
 0x1ee   :  { %1320 = vperm.xlu0 %1770, %v1210_v56   ;;  %1407 = vperm.xlu1 %1771, %v1253_v57   ;;  %v1242_v15 = vmul.f32 %v1210_v56, %v2524_v31  ;;  %v1161_v31 = vld [vmem:[%s2739_s3 + $0x50] sm:$0xff] }
 0x1ef   :  { %v1182_v2 = vadd.f32 0.001, %v1150_v61  ;;  %v1209_v38 = vmul.f32 %v1895_v6, %v1161_v31  ;;  %v1165_v6 = vld [vmem:[%s2739_s3 + $0x70] sm:$0xff] }
 0x1f0   :  { %v1258_v7 = vsub.f32 %v1226_v63, %v1242_v15 }
 0x1f1   :  { %1900 = vrsqrt.f32 %v1182_v2  ;;  %v1241_v3 = vmul.f32 %v1209_v38, %v2521_v19  ;;  %v1230_v19 = vld [vmem:[%s2740_s4 + $0x78] sm:$0xff]  ;;  %v1227_v2 = vld [vmem:[%s2740_s4 + $0x60] sm:$0xff] }
 0x1f2   :  { %1432 = vperm.xlu0 %1770, %v1258_v7   ;;  %1305 = vperm.xlu1 %1771, %v1207_v59   ;;  %1902 = vrsqrt.f32 %v1181_v37 }
 0x1f3   :  { %v1897_v30 = vpop.eup %1896  ;;  %v1257_v56 = vsub.f32 %v1225_v55, %v1241_v3 }
 0x1f4   :  { %v1212_v39 = vmul.f32 %v1897_v30, %v1164_v11  ;;  %v1899_v46 = vpop.eup %1898 }
 0x1f5   :  { %v1211_v59 = vmul.f32 %v1899_v46, %v1163_v32 }
 0x1f6   :  { %1330 = vperm.xlu0 %1770, %v1212_v39   ;;  %1417 = vperm.xlu1 %1771, %v1255_v44   ;;  %v1244_v0 = vmul.f32 %v1212_v39, %v2543_v49 }
 0x1f7   :  { %v1243_v15 = vmul.f32 %v1211_v59, %v2541_v26  ;;  %v1229_v26 = vld [vmem:[%s2740_s4 + $0x70] sm:$0xff] }
 0x1f8   :  { %v1260_v51 = vsub.f32 %v1228_v41, %v1244_v0 }
 0x1f9   :  { %v1259_v7 = vsub.f32 %v1227_v2, %v1243_v15 }
 0x1fa   :  { %1442 = vperm.xlu0 %1770, %v1260_v51   ;;  %1315 = vperm.xlu1 %1771, %v1209_v38  }
 0x1fb   :  { %v1901_v49 = vpop.eup %1900 }
 0x1fc   :  { %v1214_v57 = vmul.f32 %v1901_v49, %v1166_v35  ;;  %v1903_v62 = vpop.eup %1902 }
 0x1fd   :  { %v1213_v12 = vmul.f32 %v1903_v62, %v1165_v6 }
 0x1fe   :  { %1427 = vperm.xlu1 %1771, %v1257_v56   ;;  %1340 = vperm.xlu0 %1770, %v1214_v57   ;;  %v1246_v61 = vmul.f32 %v1214_v57, %v2561_v25 }
 0x1ff   :  { %v1245_v11 = vmul.f32 %v1213_v12, %v2559_v20 }
 0x200   :  { %v1262_v63 = vsub.f32 %v1230_v19, %v1246_v61 }
 0x201   :  { %v1261_v25 = vsub.f32 %v1229_v26, %v1245_v11 }
 0x202   :  { %1325 = vperm.xlu1 %1771, %v1211_v59   ;;  %1452 = vperm.xlu0 %1770, %v1262_v63  }
 0x206   :  { %1437 = vperm.xlu1 %1771, %v1259_v7  }
 0x20a   :  { %1335 = vperm.xlu1 %1771, %v1213_v12  }
 0x20e   :  { %1447 = vperm.xlu1 %1771, %v1261_v25  }
 0x243   :  { %v1271_v29 = vpop.permute.xlu1 %1270 }
 0x244   :  { %v1345_v30 = vmul.f32 %v1271_v29, %v2266_v5  ;;  %v1346_v37 = vmul.f32 %v1271_v29, %v2268_v8 }
 0x245   :  { %v1266_v31 = vpop.permute.xlu0 %1265 }
 0x246   :  { %v1343_v39 = vmul.f32 %v1266_v31, %v2262_v1  ;;  %v1344_v44 = vmul.f32 %v1266_v31, %v2264_v33 }
 0x249   :  { %v1383_v20 = vpop.permute.xlu0 %1382  ;;  %v1378_v38 = vpop.permute.xlu1 %1377 }
 0x24a   :  { %v1457_v41 = vadd.f32 %v1383_v20, %v1345_v30  ;;  %v1458_v0 = vadd.f32 %v1383_v20, %v1346_v37  ;;  %v1455_v51 = vadd.f32 %v1378_v38, %v1343_v39  ;;  %v1456_v3 = vadd.f32 %v1378_v38, %v1344_v44 }
 0x24c   :  { %v1722_v55 = vpack.c.bf16 %v1458_v0, %v1457_v41  ;;  %v1721_v35 = vpack.c.bf16 %v1456_v3, %v1455_v51 }
 0x24d   :  { %v1276_v32 = vpop.permute.xlu1 %1275 }
 0x24e   :  { %1587 = vst.msk [vmem:[%s2741_s5 + $0x8] sm:$0xff] %vm2624_vm3, %v1722_v55  ;;  %1586 = vst.msk [vmem:[%s2741_s5] sm:$0xff] %vm2624_vm3, %v1721_v35  ;;  %v1347_v49 = vmul.f32 %v1276_v32, %v2282_v18  ;;  %v1348_v56 = vmul.f32 %v1276_v32, %v2285_v23 }
 0x251   :  { %v1281_v1 = vpop.permute.xlu1 %1280  ;;  %v1393_v8 = vpop.permute.xlu0 %1392 }
 0x252   :  { %v1349_v33 = vmul.f32 %v1281_v1, %v2288_v27  ;;  %v1350_v5 = vmul.f32 %v1281_v1, %v2294_v34 }
 0x254   :  { %v1461_v57 = vadd.f32 %v1393_v8, %v1349_v33  ;;  %v1462_v59 = vadd.f32 %v1393_v8, %v1350_v5 }
 0x255   :  { %v1388_v19 = vpop.permute.xlu1 %1387 }
 0x256   :  { %v1724_v61 = vpack.c.bf16 %v1462_v59, %v1461_v57  ;;  %v1459_v63 = vadd.f32 %v1388_v19, %v1347_v49  ;;  %v1460_v15 = vadd.f32 %v1388_v19, %v1348_v56 }
 0x258   :  { %1589 = vst.msk [vmem:[%s2741_s5 + $0x18] sm:$0xff] %vm2624_vm3, %v1724_v61  ;;  %v1723_v27 = vpack.c.bf16 %v1460_v15, %v1459_v63 }
 0x259   :  { %v1286_v62 = vpop.permute.xlu1 %1285  ;;  %v1403_v18 = vpop.permute.xlu0 %1402 }
 0x25a   :  { %1588 = vst.msk [vmem:[%s2741_s5 + $0x10] sm:$0xff] %vm2624_vm3, %v1723_v27  ;;  %v1351_v6 = vmul.f32 %v1286_v62, %v2306_v45  ;;  %v1352_v7 = vmul.f32 %v1286_v62, %v2311_v50 }
 0x25d   :  { %v1291_v23 = vpop.permute.xlu1 %1290 }
 0x25e   :  { %v1353_v34 = vmul.f32 %v1291_v23, %v2314_v54  ;;  %v1354_v2 = vmul.f32 %v1291_v23, %v2318_v58 }
 0x260   :  { %v1465_v12 = vadd.f32 %v1403_v18, %v1353_v34  ;;  %v1466_v11 = vadd.f32 %v1403_v18, %v1354_v2 }
 0x261   :  { %v1413_v26 = vpop.permute.xlu0 %1412  ;;  %v1398_v25 = vpop.permute.xlu1 %1397 }
 0x262   :  { %v1726_v29 = vpack.c.bf16 %v1466_v11, %v1465_v12  ;;  %v1463_v31 = vadd.f32 %v1398_v25, %v1351_v6  ;;  %v1464_v30 = vadd.f32 %v1398_v25, %v1352_v7 }
 0x264   :  { %1591 = vst.msk [vmem:[%s2741_s5 + $0x28] sm:$0xff] %vm2624_vm3, %v1726_v29  ;;  %v1725_v54 = vpack.c.bf16 %v1464_v30, %v1463_v31 }
 0x265   :  { %v1311_v37 = vpop.permute.xlu0 %1310  ;;  %v1296_v58 = vpop.permute.xlu1 %1295 }
 0x266   :  { %1590 = vst.msk [vmem:[%s2741_s5 + $0x20] sm:$0xff] %vm2624_vm3, %v1725_v54  ;;  %v1361_v45 = vmul.f32 %v1311_v37, %v2362_v47  ;;  %v1362_v50 = vmul.f32 %v1311_v37, %v2366_v53  ;;  %v1355_v51 = vmul.f32 %v1296_v58, %v2334_v10  ;;  %v1356_v32 = vmul.f32 %v1296_v58, %v2336_v13 }
 0x269   :  { %v1423_v39 = vpop.permute.xlu0 %1422  ;;  %v1301_v44 = vpop.permute.xlu1 %1300 }
 0x26a   :  { %v1473_v20 = vadd.f32 %v1423_v39, %v1361_v45  ;;  %v1474_v38 = vadd.f32 %v1423_v39, %v1362_v50  ;;  %v1357_v41 = vmul.f32 %v1301_v44, %v2338_v16  ;;  %v1358_v0 = vmul.f32 %v1301_v44, %v2342_v22 }
 0x26c   :  { %v1730_v3 = vpack.c.bf16 %v1474_v38, %v1473_v20  ;;  %v1469_v55 = vadd.f32 %v1413_v26, %v1357_v41  ;;  %v1470_v35 = vadd.f32 %v1413_v26, %v1358_v0 }
 0x26d   :  { %v1321_v1 = vpop.permute.xlu0 %1320  ;;  %v1408_v33 = vpop.permute.xlu1 %1407 }
 0x26e   :  { %1595 = vst.msk [vmem:[%s2741_s5 + $0x48] sm:$0xff] %vm2624_vm3, %v1730_v3  ;;  %v1728_v47 = vpack.c.bf16 %v1470_v35, %v1469_v55  ;;  %v1467_v53 = vadd.f32 %v1408_v33, %v1355_v51  ;;  %v1468_v16 = vadd.f32 %v1408_v33, %v1356_v32  ;;  %v1365_v10 = vmul.f32 %v1321_v1, %v2386_v14 }
 0x26f   :  { %v1366_v13 = vmul.f32 %v1321_v1, %v2390_v21 }
 0x270   :  { %1593 = vst.msk [vmem:[%s2741_s5 + $0x38] sm:$0xff] %vm2624_vm3, %v1728_v47  ;;  %v1727_v22 = vpack.c.bf16 %v1468_v16, %v1467_v53 }
 0x271   :  { %v1433_v5 = vpop.permute.xlu0 %1432  ;;  %v1306_v8 = vpop.permute.xlu1 %1305 }
 0x272   :  { %v1477_v49 = vadd.f32 %v1433_v5, %v1365_v10  ;;  %v1478_v56 = vadd.f32 %v1433_v5, %v1366_v13  ;;  %1592 = vst.msk [vmem:[%s2741_s5 + $0x30] sm:$0xff] %vm2624_vm3, %v1727_v22  ;;  %v1359_v59 = vmul.f32 %v1306_v8, %v2358_v40  ;;  %v1360_v19 = vmul.f32 %v1306_v8, %v2360_v43 }
 0x274   :  { %v1732_v57 = vpack.c.bf16 %v1478_v56, %v1477_v49 }
 0x275   :  { %v1331_v61 = vpop.permute.xlu0 %1330  ;;  %v1418_v14 = vpop.permute.xlu1 %1417 }
 0x276   :  { %1597 = vst.msk [vmem:[%s2741_s5 + $0x58] sm:$0xff] %vm2624_vm3, %v1732_v57  ;;  %v1471_v21 = vadd.f32 %v1418_v14, %v1359_v59  ;;  %v1472_v63 = vadd.f32 %v1418_v14, %v1360_v19  ;;  %v1369_v15 = vmul.f32 %v1331_v61, %v2410_v52  ;;  %v1370_v27 = vmul.f32 %v1331_v61, %v2414_v60 }
 0x278   :  { %v1729_v62 = vpack.c.bf16 %v1472_v63, %v1471_v21 }
 0x279   :  { %v1443_v18 = vpop.permute.xlu0 %1442  ;;  %v1316_v23 = vpop.permute.xlu1 %1315 }
 0x27a   :  { %1594 = vst.msk [vmem:[%s2741_s5 + $0x40] sm:$0xff] %vm2624_vm3, %v1729_v62  ;;  %v1481_v40 = vadd.f32 %v1443_v18, %v1369_v15  ;;  %v1482_v43 = vadd.f32 %v1443_v18, %v1370_v27  ;;  %v1363_v2 = vmul.f32 %v1316_v23, %v2382_v4  ;;  %v1364_v6 = vmul.f32 %v1316_v23, %v2384_v9 }
 0x27c   :  { %v1734_v34 = vpack.c.bf16 %v1482_v43, %v1481_v40 }
 0x27d   :  { %v1341_v7 = vpop.permute.xlu0 %1340  ;;  %v1428_v52 = vpop.permute.xlu1 %1427 }
 0x27e   :  { %1599 = vst.msk [vmem:[%s2741_s5 + $0x68] sm:$0xff] %vm2624_vm3, %v1734_v34  ;;  %v1475_v60 = vadd.f32 %v1428_v52, %v1363_v2  ;;  %v1476_v12 = vadd.f32 %v1428_v52, %v1364_v6  ;;  %v1373_v11 = vmul.f32 %v1341_v7, %v2434_v28  ;;  %v1374_v26 = vmul.f32 %v1341_v7, %v2438_v36 }
 0x280   :  { %v1731_v25 = vpack.c.bf16 %v1476_v12, %v1475_v60 }
 0x281   :  { %v1453_v29 = vpop.permute.xlu0 %1452  ;;  %v1326_v31 = vpop.permute.xlu1 %1325 }
 0x282   :  { %1596 = vst.msk [vmem:[%s2741_s5 + $0x50] sm:$0xff] %vm2624_vm3, %v1731_v25  ;;  %v1485_v4 = vadd.f32 %v1453_v29, %v1373_v11  ;;  %v1486_v9 = vadd.f32 %v1453_v29, %v1374_v26  ;;  %v1367_v54 = vmul.f32 %v1326_v31, %v2406_v42  ;;  %v1368_v37 = vmul.f32 %v1326_v31, %v2408_v48 }
 0x284   :  { %v1736_v30 = vpack.c.bf16 %v1486_v9, %v1485_v4 }
 0x285   :  { %v1438_v58 = vpop.permute.xlu1 %1437 }
 0x286   :  { %1601 = vst.msk [vmem:[%s2741_s5 + $0x78] sm:$0xff] %vm2624_vm3, %v1736_v30  ;;  %v1479_v28 = vadd.f32 %v1438_v58, %v1367_v54  ;;  %v1480_v36 = vadd.f32 %v1438_v58, %v1368_v37 }
 0x288   :  { %v1733_v45 = vpack.c.bf16 %v1480_v36, %v1479_v28 }
 0x289   :  { %v1336_v50 = vpop.permute.xlu1 %1335 }
 0x28a   :  { %1598 = vst.msk [vmem:[%s2741_s5 + $0x60] sm:$0xff] %vm2624_vm3, %v1733_v45  ;;  %v1371_v42 = vmul.f32 %v1336_v50, %v2430_v17  ;;  %v1372_v48 = vmul.f32 %v1336_v50, %v2432_v24 }
 0x28d   :  { %v1448_v39 = vpop.permute.xlu1 %1447 }
 0x28e   :  { %v1483_v44 = vadd.f32 %v1448_v39, %v1371_v42  ;;  %v1484_v20 = vadd.f32 %v1448_v39, %v1372_v48 }
 0x290   :  { %v1735_v38 = vpack.c.bf16 %v1484_v20, %v1483_v44 }
 0x292   :  { %1600 = vst.msk [vmem:[%s2741_s5 + $0x70] sm:$0xff] %vm2624_vm3, %v1735_v38 }

</bundles_post_ra>
